<compile_context>
chip_gen: v5e
topology: v5e:2x2
jax: 0.10.0
libtpu: 0.0.40
codegen_flags: <defaults>
</compile_context>

<pallas_src>
import jax
import jax.numpy as jnp
from jax.experimental import pallas as pl
from jax.experimental.pallas import tpu as pltpu

# ----------------------------- config ---------------------------------------
B = 2          # batch
S = 8          # sequence length
D_MODEL = 32   # d_model
D_FF = 64      # feed-forward hidden width
DROPOUT = 0.1  # eval mode -> identity


# ----------------------------- kernel ---------------------------------------
def ffn_kernel(x_ref,    # (rows_per_step, D_MODEL)
               w1_ref,   # (D_MODEL, D_FF)
               b1_ref,   # (1, D_FF)
               w2_ref,   # (D_FF, D_MODEL)
               b2_ref,   # (1, D_MODEL)
               o_ref):   # (rows_per_step, D_MODEL)
  x = x_ref[...].astype(jnp.float32)

  # Linear 1 + ReLU (hidden stays resident in vregs; no VMEM round-trip).
  h = jnp.dot(x, w1_ref[...], preferred_element_type=jnp.float32) + b1_ref[0]
  h = jnp.maximum(h, 0.0)

  # Dropout layers are identity in eval mode.
  # TODO(synk): training-mode stochastic dropout (pltpu.prng_*) not implemented.

  # Linear 2.
  y = jnp.dot(h, w2_ref[...], preferred_element_type=jnp.float32) + b2_ref[0]

  o_ref[...] = y.astype(o_ref.dtype)


# ----------------------------- wrapper ---------------------------------------
def feed_forward(x, w1, b1, w2, b2):
  """x: (B, S, D_MODEL).  w1: (D_MODEL, D_FF), b1: (1, D_FF),
     w2: (D_FF, D_MODEL), b2: (1, D_MODEL).  Returns (B, S, D_MODEL)."""
  b_, s_, d_ = x.shape
  n_rows = b_ * s_
  x2d = x.reshape(n_rows, d_)

  # Two parallel row-blocks: maps onto the 2 TensorCores on v7x; on v5e/v6e the
  # second step is a cheap extra iteration (weights are grid-invariant -> DMA'd once).
  n_blocks = 2
  rows_per_step = n_rows // n_blocks
  assert rows_per_step % 8 == 0, "row block must be a multiple of 8 sublanes"

  def full_spec(shape):
    ndim = len(shape)
    return pl.BlockSpec(shape, lambda i, _n=ndim: (0,) * _n)

  out2d = pl.pallas_call(
      ffn_kernel,
      out_shape=jax.ShapeDtypeStruct((n_rows, d_), x.dtype),
      grid_spec=pltpu.PrefetchScalarGridSpec(
          num_scalar_prefetch=0,
          grid=(n_blocks,),
          in_specs=[
              pl.BlockSpec((rows_per_step, d_), lambda i: (i, 0)),  # x rows
              full_spec(w1.shape),                                  # W1 (resident)
              full_spec(b1.shape),                                  # b1
              full_spec(w2.shape),                                  # W2
              full_spec(b2.shape),                                  # b2
          ],
          out_specs=pl.BlockSpec((rows_per_step, d_), lambda i: (i, 0)),
      ),
      compiler_params=pltpu.CompilerParams(
          dimension_semantics=("parallel",)),
  )(x2d, w1, b1, w2, b2)

  return out2d.reshape(b_, s_, d_)


# ----------------------------- reference (pure JAX) ---------------------------
def feed_forward_ref(x, w1, b1, w2, b2):
  h = jnp.maximum(x @ w1 + b1[0], 0.0)   # dropout = identity in eval mode
  return h @ w2 + b2[0]


# ----------------------------- main -------------------------------------------
if __name__ == "__main__":
  key = jax.random.PRNGKey(0)
  keys = jax.random.split(key, 5)

  def init(k, shape, scale=0.1):
    return (scale * jax.random.normal(k, shape)).astype(jnp.float32)

  # Weights stored as (in, out); equivalent to nn.Linear weight (out, in) transposed.
  w1 = init(keys[0], (D_MODEL, D_FF))
  b1 = init(keys[1], (1, D_FF))
  w2 = init(keys[2], (D_FF, D_MODEL))
  b2 = init(keys[3], (1, D_MODEL))

  x = init(keys[4], (B, S, D_MODEL), scale=1.0)

  out = feed_forward(x, w1, b1, w2, b2)
  out = jax.block_until_ready(out)

  ref = feed_forward_ref(x, w1, b1, w2, b2)
  assert out.shape == (B, S, D_MODEL)
  assert jnp.allclose(out, ref, rtol=1e-4, atol=1e-4), "mismatch vs reference"

  print("KERNEL_OK")
</pallas_src>

<mosaic_0001>
module attributes {stable_mosaic.version = 11 : i64} {
  func.func @ffn_kernel(%arg0: i32, %arg1: memref<8x32xf32, #tpu.memory_space<vmem>>, %arg2: memref<32x64xf32, #tpu.memory_space<vmem>>, %arg3: memref<1x64xf32, #tpu.memory_space<vmem>>, %arg4: memref<64x32xf32, #tpu.memory_space<vmem>>, %arg5: memref<1x32xf32, #tpu.memory_space<vmem>>, %arg6: memref<8x32xf32, #tpu.memory_space<vmem>>) attributes {dimension_semantics = [#tpu.dimension_semantics<parallel>], iteration_bounds = array<i64: 2>, scalar_prefetch = 0 : i64, scratch_operands = 0 : i64, tpu.core_type = #tpu.core_type<tc>, window_params = [{transform_indices = @transform_0, window_bounds = array<i64: 8, 32>}, {pipeline_mode = #tpu.pipeline_mode<synchronous>, transform_indices = @transform_1, window_bounds = array<i64: 32, 64>}, {pipeline_mode = #tpu.pipeline_mode<synchronous>, transform_indices = @transform_2, window_bounds = array<i64: 1, 64>}, {pipeline_mode = #tpu.pipeline_mode<synchronous>, transform_indices = @transform_3, window_bounds = array<i64: 64, 32>}, {pipeline_mode = #tpu.pipeline_mode<synchronous>, transform_indices = @transform_4, window_bounds = array<i64: 1, 32>}, {transform_indices = @transform_5, window_bounds = array<i64: 8, 32>}]} {
    %c0 = arith.constant 0 : index
    %c0_0 = arith.constant 0 : index
    %0 = vector.load %arg1[%c0, %c0_0] : memref<8x32xf32, #tpu.memory_space<vmem>>, vector<8x32xf32>
    %c0_1 = arith.constant 0 : index
    %c0_2 = arith.constant 0 : index
    %1 = vector.load %arg2[%c0_1, %c0_2] : memref<32x64xf32, #tpu.memory_space<vmem>>, vector<32x64xf32>
    %cst = arith.constant dense<0.000000e+00> : vector<8x64xf32>
    %2 = tpu.matmul %0, %1, %cst {dimension_numbers = #tpu.dot_dimension_numbers<[1], [0], [0], [1], [0, 0, 1, 1], [], []>} : vector<8x32xf32>, vector<32x64xf32>, vector<8x64xf32> -> vector<8x64xf32>
    %c0_3 = arith.constant 0 : index
    %c0_4 = arith.constant 0 : index
    %3 = vector.load %arg3[%c0_3, %c0_4] : memref<1x64xf32, #tpu.memory_space<vmem>>, vector<1x64xf32>
    %4 = vector.shape_cast %3 : vector<1x64xf32> to vector<64xf32>
    %5 = vector.shape_cast %4 : vector<64xf32> to vector<1x64xf32>
    %6 = vector.broadcast %5 : vector<1x64xf32> to vector<8x64xf32>
    %7 = arith.addf %2, %6 : vector<8x64xf32>
    %cst_5 = arith.constant 0.000000e+00 : f32
    %8 = vector.broadcast %cst_5 : f32 to vector<8x64xf32>
    %9 = arith.maximumf %7, %8 : vector<8x64xf32>
    %c0_6 = arith.constant 0 : index
    %c0_7 = arith.constant 0 : index
    %10 = vector.load %arg4[%c0_6, %c0_7] : memref<64x32xf32, #tpu.memory_space<vmem>>, vector<64x32xf32>
    %cst_8 = arith.constant dense<0.000000e+00> : vector<8x32xf32>
    %11 = tpu.matmul %9, %10, %cst_8 {dimension_numbers = #tpu.dot_dimension_numbers<[1], [0], [0], [1], [0, 0, 1, 1], [], []>} : vector<8x64xf32>, vector<64x32xf32>, vector<8x32xf32> -> vector<8x32xf32>
    %c0_9 = arith.constant 0 : index
    %c0_10 = arith.constant 0 : index
    %12 = vector.load %arg5[%c0_9, %c0_10] : memref<1x32xf32, #tpu.memory_space<vmem>>, vector<1x32xf32>
    %13 = vector.shape_cast %12 : vector<1x32xf32> to vector<32xf32>
    %14 = vector.shape_cast %13 : vector<32xf32> to vector<1x32xf32>
    %15 = vector.broadcast %14 : vector<1x32xf32> to vector<8x32xf32>
    %16 = arith.addf %11, %15 : vector<8x32xf32>
    %c0_11 = arith.constant 0 : index
    %c0_12 = arith.constant 0 : index
    %17 = vector.load %arg6[%c0_11, %c0_12] : memref<8x32xf32, #tpu.memory_space<vmem>>, vector<8x32xf32>
    tpu.vector_store %arg6[%c0_11, %c0_12], %16 {strides = array<i32>} : memref<8x32xf32, #tpu.memory_space<vmem>>, vector<8x32xf32>,
    return
  }
  func.func @transform_0(%arg0: i32) -> (i32, i32) {
    %c0_i32 = arith.constant 0 : i32
    %c0_i32_0 = arith.constant 0 : i32
    return %arg0, %c0_i32 : i32, i32
  }
  func.func @transform_1(%arg0: i32) -> (i32, i32) {
    %c0_i32 = arith.constant 0 : i32
    %c0_i32_0 = arith.constant 0 : i32
    %c0_i32_1 = arith.constant 0 : i32
    return %c0_i32, %c0_i32_0 : i32, i32
  }
  func.func @transform_2(%arg0: i32) -> (i32, i32) {
    %c0_i32 = arith.constant 0 : i32
    %c0_i32_0 = arith.constant 0 : i32
    %c0_i32_1 = arith.constant 0 : i32
    return %c0_i32, %c0_i32_0 : i32, i32
  }
  func.func @transform_3(%arg0: i32) -> (i32, i32) {
    %c0_i32 = arith.constant 0 : i32
    %c0_i32_0 = arith.constant 0 : i32
    %c0_i32_1 = arith.constant 0 : i32
    return %c0_i32, %c0_i32_0 : i32, i32
  }
  func.func @transform_4(%arg0: i32) -> (i32, i32) {
    %c0_i32 = arith.constant 0 : i32
    %c0_i32_0 = arith.constant 0 : i32
    %c0_i32_1 = arith.constant 0 : i32
    return %c0_i32, %c0_i32_0 : i32, i32
  }
  func.func @transform_5(%arg0: i32) -> (i32, i32) {
    %c0_i32 = arith.constant 0 : i32
    %c0_i32_0 = arith.constant 0 : i32
    return %arg0, %c0_i32 : i32, i32
  }
}

</mosaic_0001>

<bundles_post_ra>
// kernel: tpu_custom_call.1
= control target key start
LH: loop header
LB: loop body
LE: loop exit
PB: predicated region body
PF: predicated region fallthrough
CT: control target
= control target key end

     0   :  { %10 = vsyncpa [#allocation3], 0  ;;  %s642_s0 = inlined_call_operand.vmem [shape: f32[16,32], index: 0, kind: input, shape index: {}]   ;;  %s643_s1 = inlined_call_operand.vmem [shape: f32[32,64], index: 1, kind: input, shape index: {}]   ;;  %s644_s2 = inlined_call_operand.vmem [shape: f32[1,64], index: 2, kind: input, shape index: {}]   ;;  %s645_s3 = inlined_call_operand.vmem [shape: f32[64,32], index: 3, kind: input, shape index: {}]   ;;  %s646_s4 = inlined_call_operand.vmem [shape: f32[1,32], index: 4, kind: input, shape index: {}]   ;;  %s647_s5 = inlined_call_operand.hbm [shape: f32[16,32], index: 5, kind: output, shape index: {}]  }
   0x1   :  { %12 = vsyncpa [#allocation3 + $0x1], 0  ;;  %s513_s18 = smov 0   ;;  %s515_s19 = smov 0  }
   0x2   :  { %s517_s20 = smov 0   ;;  %s519_s21 = smov 0  }
   0x3 LB: > { %s534_s22 = sadd.s32 4294967295, %s481_s21   ;;  %s366_s23 = sadd.s32 4294967294, %s481_s21   ;;  %s481_s21 = sphi %s519_s21, %s653_s21   ;;  %s477_s20 = sphi %s517_s20, %s652_s20   ;;  %s473_s19 = sphi %s515_s19, %s651_s19   ;;  %s469_s18 = sphi %s513_s18, %s650_s18  }
   0x4   : > { %s538_s24 = sadd.s32 1, %s481_s21   ;;  %s135_s25 = sadd.s32 1, %s477_s20 }
   0x5   : > { %s132_s26 = ssub.s32 %s481_s21, %s538_s24  ;;  %p145_p0 = scmp.ne.s32.totalorder %s477_s20, %s473_s19 }
   0x6   : > { %p133_p1 = scmp.eq.s32.totalorder %s132_s26, 0  ;;  %p146_p2 = scmp.eq.s32.totalorder %s534_s22, 1 }
   0x7   : > { %p151_p3 = scmp.ne.s32.totalorder %s473_s19, %s469_s18  ;;  %p152_p4 = scmp.eq.s32.totalorder %s366_s23, 1 }
   0x8   : > { %s549_s27 = scalar_select %p133_p1, %s477_s20, %s135_s25  }
   0x9   : > { %p551_p5 = por %p146_p2, %p145_p0  ;;  %p555_p6 = por %p152_p4, %p151_p3 }
   0xa   : > { %p369_p7 = scmp.ge.s32.totalorder %s481_s21, 1  ;;  %p189_p8 = scmp.lt.s32.totalorder %s481_s21, 3 }
   0xc   : > { %p190_p9 = pnand %p369_p7, %p189_p8 }
   0xd   : > { %p216_p10 = scmp.lt.s32.totalorder (!%p190_p9), %s534_s22, 1  ;;  %s375_s6 = sshll.u32 (!%p190_p9), %s534_s22, 3 }
   0xe   : > { %193 = sbr.rel (%p190_p9) target bundleno = 288 (0x120), region = 40  ;;  %s302_s9 = scalar_lea.hbm (!%p190_p9), %s647_s5, %s375_s6 }
   0xf   : > { %s306_s14 = sshll.u32 (!%p190_p9), %s302_s9, 4  ;;  %s439_s25 = scalar_lea.hbm (!%p190_p9), %s647_s5, 16  ;;  %s307_s14 = int_to_ptr.hbm [resolvable:$true] %s306_s14 }
  0x13   : > { %v224_v0 = vld [vmem:[%s643_s1 + $0x18] sm:$0xff]  ;;  %v223_v1 = vld [vmem:[%s643_s1 + $0x10] sm:$0xff]  ;;  %v222_v4 = vld [vmem:[%s643_s1 + $0x8] sm:$0xff]  ;;  %s217_s15 = scalar_select %p216_p10, %s534_s22, 1  ;;  %vm229_vm0 = vcmask 261120   ;;  %vm266_vm1 = vcmask 523264  }
  0x14   : > { %245 = vmatpush.msra.mxu0 %v224_v0  ;;  %v261_v2 = vld [vmem:[%s645_s3 + $0x38] sm:$0xff]  ;;  %v260_v3 = vld [vmem:[%s645_s3 + $0x30] sm:$0xff]  ;;  %v259_v5 = vld [vmem:[%s645_s3 + $0x28] sm:$0xff]  ;;  %s433_s22 = sshra.s32 %s307_s14, 4  ;;  %s434_s22 = int_to_ptr.hbm [resolvable:$true] %s433_s22 }
  0x15   : > { %278 = vmatpush.msra.mxu1 %v261_v2  ;;  %v221_v6 = vld [vmem:[%s643_s1] sm:$0xff]  ;;  %s371_s26 = sshll.u32 %s217_s15, 3  ;;  %v257_v9 = vld [vmem:[%s645_s3 + $0x18] sm:$0xff]  ;;  %v256_v10 = vld [vmem:[%s645_s3 + $0x10] sm:$0xff]  ;;  %s435_s16 = scalar_lea.hbm %s434_s22, 8 }
  0x16   : > { %246 = vmatpush.msra.mxu0 %v223_v1  ;;  %s219_s7 = scalar_lea.vmem %s642_s0, %s371_s26  ;;  %v258_v7 = vld [vmem:[%s645_s3 + $0x20] sm:$0xff]  ;;  %v255_v11 = vld [vmem:[%s645_s3 + $0x8] sm:$0xff]  ;;  %s213_s26 = sand.u32 1, %s473_s19  }
  0x17   : > { %279 = vmatpush.msra.mxu1 %v260_v3  ;;  %v220_v8 = vld [vmem:[%s219_s7] sm:$0xff]  ;;  %s370_s30 = sshll.u32 %s213_s26, 3  ;;  %s292_s15 = scalar_lea.sflag [#allocation3], %s213_s26 }
  0x18   : > { %247 = vmatpush.msra.mxu0 %v222_v4  ;;  %v254_v12 = vld [vmem:[%s645_s3] sm:$0xff]  ;;  %s215_s12 = scalar_lea.vmem [#allocation2], %s370_s30  ;;  %p436_p11 = scmp.ne.s32.totalorder %s434_s22, %s435_s16 }
  0x19   : > { %280 = vmatpush.msra.mxu1 %v259_v5  ;;  %v417_v13 = vld [vmem:[%s644_s2] ss:$0 sm:$0xff]  ;;  %s304_s13 = sshll.u32 %s215_s12, 4  ;;  %p440_p0 = scmp.lt.s32.totalorder %s434_s22, %s647_s5  ;;  %s305_s13 = int_to_ptr.vmem [resolvable:$true] %s304_s13 }
  0x1a   : > { %248 = vmatpush.msra.mxu0 %v221_v6  ;;  %v418_v17 = vld [vmem:[%s646_s4] ss:$0 sm:$0xff]  ;;  %p437_p12 = pnand %p436_p11, %p551_p5  ;;  %p441_p1 = scmp.lt.s32.totalorder %s439_s25, %s435_s16 }
  0x1b   : > { %372 = vmatmul.msk.f32.vlgmr.msra.gmra.mxu0 %vm229_vm0, %v220_v8  ;;  %281 = vmatpush.msra.mxu1 %v258_v7 }
  0x1c   : > { %p438_p13 = pneg %p437_p12  ;;  %p442_p2 = por %p441_p1, %p440_p0 }
  0x1d   : > { %282 = vmatpush.msra.mxu1 %v257_v9 }
  0x1e   : > { %p443_p3 = pnand %p442_p2, %p438_p13 }
  0x1f   : > { %283 = vmatpush.msra.mxu1 %v256_v10 }
  0x21   : > { %284 = vmatpush.msra.mxu1 %v255_v11 }
  0x23   : > { %285 = vmatpush.msra.mxu1 %v254_v12 }
  0x98   : > { %v250_v14 = vpop.f32.mrf.mxu0 }
  0x99   : > { %v251_v15 = vadd.f32 %v417_v13, %v250_v14 }
  0x9b   : > { %v253_v16 = vmax.f32 %v251_v15, 0.0 }
  0x9d   : > { %373 = vmatmul.msk.f32.vlgmr.msra.gmra.mxu1 %vm266_vm1, %v253_v16 }
 0x11a   : > { %v287_v18 = vpop.f32.mrf.mxu1 }
 0x11b   : > { %v288_v19 = vadd.f32 %v418_v17, %v287_v18 }
 0x11d   : > { %290 = vst.msk [vmem:[%s215_s12] sm:$0xff] %vm229_vm0, %v288_v19 }
 0x11e   : > { %446 = shalt.err (!%p443_p3)
}
 0x11f   : > { %378 = dma.vmem_to_hbm [thread:$0]  (%p551_p5), %s305_s13, 128, %s307_s14, %s292_s15  }
 0x120 PF: > { %p384_p4 = scmp.ge.s32.totalorder %s481_s21, 2  ;;  %s318_s26 = sand.u32 1, %s469_s18  }
 0x121   : > { %s319_s7 = scalar_lea.sflag [#allocation3], %s318_s26 }
 0x122   : > { %p381_p7 = pnand %p384_p4, %p555_p6 }
 0x124   : > { %p382_p8 = pneg %p381_p7 }
 0x126   : > { %464 = dma.done.wait (%p382_p8), %s319_s7, 128  }
 0x127   : > { %466 = vsyncadd (%p382_p8), %s319_s7, 4294967168  ;;  %p15_p9 = scmp.ge.s32.totalorder %s538_s24, 4   ;;  %s650_s18 = smov %s473_s19 }
 0x128   : > { %s651_s19 = smov %s477_s20  ;;  %s652_s20 = smov %s549_s27 }
 0x129   : > { %s653_s21 = smov %s538_s24  ;;  %17 = sbr.rel (!%p15_p9) target bundleno = 3 (0x3), region = 75 }
 0x12e   :  { %325 = vsyncpa [#allocation3], 1 }
 0x12f   :  { %327 = vsyncpa [#allocation3 + $0x1], 1 }

</bundles_post_ra>
